<compile_context>
chip_gen: v5e
topology: v5e:2x2
jax: 0.10.0
libtpu: 0.0.40
codegen_flags: <defaults>
</compile_context>

<pallas_src>
import jax
import jax.numpy as jnp
from jax.experimental import pallas as pl
from jax.experimental.pallas import tpu as pltpu


def _round_up(v, m):
    return (v + m - 1) // m * m


def _pick_batch_block(B, C_in, C_out, HW, budget_bytes=20 * 1024 * 1024, max_bb=8):
    """Largest divisor of B (<= max_bb) whose double-buffered f32 block footprint fits."""
    best = 1
    for bb in range(1, min(B, max_bb) + 1):
        if B % bb:
            continue
        rows = _round_up(bb * C_in, 8) + _round_up(bb * C_out, 8)
        if 2 * rows * HW * 4 <= budget_bytes:  # double-buffered in+out blocks, f32
            best = bb
    # Keep >= 2 grid steps when possible so the "parallel" batch axis can shard across
    # v7x's two TensorCores (no-op on single-TC v5e/v6e).
    if B >= 2 and B // best < 2:
        for bb in range(best - 1, 0, -1):
            if B % bb == 0 and B // bb >= 2:
                best = bb
                break
    return best


def _make_fused_kernel(BB, C_in, C_out, E, HW, use_mxu):
    def kernel(x_ref, rw_ref, rb_ref, ew_ref, o_ref):
        # x_ref : (BB*C_in, HW)    BB samples stacked along the sublane axis
        # rw_ref: (E, C_in)        routing Linear weight
        # rb_ref: (E, 1)           routing Linear bias
        # ew_ref: (E*C_out, C_in)  expert filters; row e*C_out + o == W_e[o, :]
        # o_ref : (BB*C_out, HW)
        rw = rw_ref[...]
        rb = rb_ref[...]
        ew = ew_ref[...]
        for b in range(BB):                                   # static unroll, BB <= 8
            x_b = x_ref[b * C_in:(b + 1) * C_in, :]           # (C_in, HW)
            # 1) global average pool over the spatial (lane) axis
            p_b = jnp.mean(x_b, axis=-1, keepdims=True)       # (C_in, 1)
            # 2) routing linear + sigmoid
            logits = jnp.dot(rw, p_b, preferred_element_type=jnp.float32) + rb   # (E, 1)
            r_b = jax.nn.sigmoid(logits)                      # (E, 1)
            # 3) mix expert filters: W = sum_e r[e] * W_e     (C_out, C_in), VPU scalar-bcast
            w_b = jnp.zeros((C_out, C_in), jnp.float32)
            for e in range(E):
                w_b = w_b + r_b[e:e + 1, :] * ew[e * C_out:(e + 1) * C_out, :]
            # 4) dynamic 1x1 conv on this sample
            if use_mxu:
                # bf16 operands, f32 accumulation (MXU path for non-trivial channel counts)
                out_b = jnp.dot(w_b.astype(jnp.bfloat16), x_b.astype(jnp.bfloat16),
                                preferred_element_type=jnp.float32)
            else:
                # tiny channel counts: C_in broadcast-MACs on the VPU, idle MXU avoided
                out_b = jnp.zeros((C_out, HW), jnp.float32)
                for c in range(C_in):
                    out_b = out_b + w_b[:, c:c + 1] * x_b[c:c + 1, :]
            o_ref[b * C_out:(b + 1) * C_out, :] = out_b.astype(o_ref.dtype)
    return kernel


def dynamic_conv_single(x, routing_w, routing_b, expert_w, *, out_features, padding=1):
    """x: (B, C_in, H, W) NCHW float32.  Returns (B, out_features, H+2p, W+2p)."""
    B, C_in, H, W = x.shape
    HW = H * W
    E = routing_w.shape[0]
    C_out = out_features

    BB = _pick_batch_block(B, C_in, C_out, HW)
    G = B // BB
    use_mxu = C_in > 16  # only use the MXU once the matmul is not ~99% padding

    x_r = x.reshape(G, BB * C_in, HW)        # pure view of NCHW
    rw = routing_w                           # (E, C_in)
    rb = routing_b.reshape(E, 1)
    ew = expert_w.reshape(E * C_out, C_in)   # row e*C_out + o == W_e[o, :]

    kernel = _make_fused_kernel(BB, C_in, C_out, E, HW, use_mxu)

    out_flat = pl.pallas_call(
        kernel,
        out_shape=jax.ShapeDtypeStruct((G, BB * C_out, HW), jnp.float32),
        grid=(G,),
        in_specs=[
            pl.BlockSpec((None, BB * C_in, HW), lambda i: (i, 0, 0)),
            pl.BlockSpec((E, C_in), lambda i: (0, 0)),          # weights resident across grid
            pl.BlockSpec((E, 1), lambda i: (0, 0)),
            pl.BlockSpec((E * C_out, C_in), lambda i: (0, 0)),
        ],
        out_specs=pl.BlockSpec((None, BB * C_out, HW), lambda i: (i, 0, 0)),
        compiler_params=pltpu.CompilerParams(
            dimension_semantics=("parallel",),
            vmem_limit_bytes=32 * 1024 * 1024,
        ),
    )(x_r, rw, rb, ew)

    out = out_flat.reshape(B, C_out, H, W)
    # k=1, bias=False: CondConv2d's zero padding contributes exact zeros -> pad the output
    # border.  Kept outside the kernel so the in-kernel stores stay lane-dense / unmasked.
    if padding:
        out = jnp.pad(out, ((0, 0), (0, 0), (padding, padding), (padding, padding)))
    return out


def reference(x, routing_w, routing_b, expert_w, out_features, padding=1):
    B, C_in, H, W = x.shape
    pooled = jnp.mean(x, axis=(2, 3))
    r = jax.nn.sigmoid(pooled @ routing_w.T + routing_b)
    w = (r @ expert_w).reshape(B, out_features, C_in)
    out = jnp.einsum("boc,bchw->bohw", w, x)
    return jnp.pad(out, ((0, 0), (0, 0), (padding, padding), (padding, padding)))


if __name__ == "__main__":
    B, C_in, C_out, H, W, E = 2, 4, 8, 16, 16, 4

    key = jax.random.PRNGKey(0)
    k1, k2, k3, k4 = jax.random.split(key, 4)
    # nn.Linear(in_features, num_experts): weight (E, C_in), bias (E)
    routing_w = jax.random.normal(k1, (E, C_in), jnp.float32) * 0.1
    routing_b = jax.random.normal(k2, (E,), jnp.float32) * 0.1
    # CondConv2d weight: (num_experts, out_channels * in_channels//groups * kh * kw)
    expert_w = jax.random.normal(k3, (E, C_out * C_in * 1 * 1), jnp.float32) * 0.1
    x = jax.random.normal(k4, (B, C_in, H, W), jnp.float32)

    y = jax.block_until_ready(
        dynamic_conv_single(x, routing_w, routing_b, expert_w, out_features=C_out)
    )

    y_ref = reference(x, routing_w, routing_b, expert_w, C_out)
    assert y.shape == (B, C_out, H + 2, W + 2), y.shape
    assert jnp.allclose(y, y_ref, atol=1e-2, rtol=1e-2), float(jnp.max(jnp.abs(y - y_ref)))

    print("KERNEL_OK")
</pallas_src>

<mosaic_0001>
module attributes {stable_mosaic.version = 11 : i64} {
  func.func @kernel(%arg0: i32, %arg1: memref<1x4x256xf32, #tpu.memory_space<vmem>>, %arg2: memref<4x4xf32, #tpu.memory_space<vmem>>, %arg3: memref<4x1xf32, #tpu.memory_space<vmem>>, %arg4: memref<32x4xf32, #tpu.memory_space<vmem>>, %arg5: memref<1x8x256xf32, #tpu.memory_space<vmem>>) attributes {dimension_semantics = [#tpu.dimension_semantics<parallel>], iteration_bounds = array<i64: 2>, scalar_prefetch = 0 : i64, scratch_operands = 0 : i64, tpu.core_type = #tpu.core_type<tc>, window_params = [{transform_indices = @transform_0, window_bounds = array<i64: 1, 4, 256>}, {pipeline_mode = #tpu.pipeline_mode<synchronous>, transform_indices = @transform_1, window_bounds = array<i64: 4, 4>}, {pipeline_mode = #tpu.pipeline_mode<synchronous>, transform_indices = @transform_2, window_bounds = array<i64: 4, 1>}, {pipeline_mode = #tpu.pipeline_mode<synchronous>, transform_indices = @transform_3, window_bounds = array<i64: 32, 4>}, {transform_indices = @transform_4, window_bounds = array<i64: 1, 8, 256>}]} {
    %c0 = arith.constant 0 : index
    %c0_0 = arith.constant 0 : index
    %0 = vector.load %arg2[%c0, %c0_0] : memref<4x4xf32, #tpu.memory_space<vmem>>, vector<4x4xf32>
    %c0_1 = arith.constant 0 : index
    %c0_2 = arith.constant 0 : index
    %1 = vector.load %arg3[%c0_1, %c0_2] : memref<4x1xf32, #tpu.memory_space<vmem>>, vector<4x1xf32>
    %c0_3 = arith.constant 0 : index
    %c0_4 = arith.constant 0 : index
    %2 = vector.load %arg4[%c0_3, %c0_4] : memref<32x4xf32, #tpu.memory_space<vmem>>, vector<32x4xf32>
    %c0_5 = arith.constant 0 : index
    %c0_6 = arith.constant 0 : index
    %c0_7 = arith.constant 0 : index
    %3 = vector.load %arg1[%c0_5, %c0_6, %c0_7] : memref<1x4x256xf32, #tpu.memory_space<vmem>>, vector<1x4x256xf32>
    %4 = vector.shape_cast %3 : vector<1x4x256xf32> to vector<4x256xf32>
    %cst = arith.constant dense<0.000000e+00> : vector<4xf32>
    %5 = vector.multi_reduction <add>, %4, %cst [1] : vector<4x256xf32> to vector<4xf32>
    %6 = vector.shape_cast %5 : vector<4xf32> to vector<4x1xf32>
    %cst_8 = arith.constant 2.560000e+02 : f32
    %7 = vector.broadcast %cst_8 : f32 to vector<4x1xf32>
    %8 = arith.divf %6, %7 : vector<4x1xf32>
    %cst_9 = arith.constant dense<0.000000e+00> : vector<4x1xf32>
    %9 = tpu.matmul %0, %8, %cst_9 {dimension_numbers = #tpu.dot_dimension_numbers<[1], [0], [0], [1], [0, 0, 1, 1], [], []>} : vector<4x4xf32>, vector<4x1xf32>, vector<4x1xf32> -> vector<4x1xf32>
    %10 = arith.addf %9, %1 : vector<4x1xf32>
    %11 = arith.negf %10 : vector<4x1xf32>
    %12 = math.exp %11 : vector<4x1xf32>
    %cst_10 = arith.constant 1.000000e+00 : f32
    %13 = vector.broadcast %cst_10 : f32 to vector<4x1xf32>
    %14 = arith.addf %13, %12 : vector<4x1xf32>
    %15 = arith.divf %13, %14 : vector<4x1xf32>
    %cst_11 = arith.constant 0.000000e+00 : f32
    %16 = vector.broadcast %cst_11 : f32 to vector<8x4xf32>
    %17 = vector.extract_strided_slice %15 {offsets = [0, 0], sizes = [1, 1], strides = [1, 1]} : vector<4x1xf32> to vector<1x1xf32>
    %18 = vector.extract_strided_slice %2 {offsets = [0, 0], sizes = [8, 4], strides = [1, 1]} : vector<32x4xf32> to vector<8x4xf32>
    %19 = vector.broadcast %17 : vector<1x1xf32> to vector<8x4xf32>
    %20 = arith.mulf %19, %18 : vector<8x4xf32>
    %21 = arith.addf %16, %20 : vector<8x4xf32>
    %22 = vector.extract_strided_slice %15 {offsets = [1, 0], sizes = [1, 1], strides = [1, 1]} : vector<4x1xf32> to vector<1x1xf32>
    %23 = vector.extract_strided_slice %2 {offsets = [8, 0], sizes = [8, 4], strides = [1, 1]} : vector<32x4xf32> to vector<8x4xf32>
    %24 = vector.broadcast %22 : vector<1x1xf32> to vector<8x4xf32>
    %25 = arith.mulf %24, %23 : vector<8x4xf32>
    %26 = arith.addf %21, %25 : vector<8x4xf32>
    %27 = vector.extract_strided_slice %15 {offsets = [2, 0], sizes = [1, 1], strides = [1, 1]} : vector<4x1xf32> to vector<1x1xf32>
    %28 = vector.extract_strided_slice %2 {offsets = [16, 0], sizes = [8, 4], strides = [1, 1]} : vector<32x4xf32> to vector<8x4xf32>
    %29 = vector.broadcast %27 : vector<1x1xf32> to vector<8x4xf32>
    %30 = arith.mulf %29, %28 : vector<8x4xf32>
    %31 = arith.addf %26, %30 : vector<8x4xf32>
    %32 = vector.extract_strided_slice %15 {offsets = [3, 0], sizes = [1, 1], strides = [1, 1]} : vector<4x1xf32> to vector<1x1xf32>
    %33 = vector.extract_strided_slice %2 {offsets = [24, 0], sizes = [8, 4], strides = [1, 1]} : vector<32x4xf32> to vector<8x4xf32>
    %34 = vector.broadcast %32 : vector<1x1xf32> to vector<8x4xf32>
    %35 = arith.mulf %34, %33 : vector<8x4xf32>
    %36 = arith.addf %31, %35 : vector<8x4xf32>
    %cst_12 = arith.constant 0.000000e+00 : f32
    %37 = vector.broadcast %cst_12 : f32 to vector<8x256xf32>
    %38 = vector.extract_strided_slice %36 {offsets = [0, 0], sizes = [8, 1], strides = [1, 1]} : vector<8x4xf32> to vector<8x1xf32>
    %39 = vector.extract_strided_slice %4 {offsets = [0, 0], sizes = [1, 256], strides = [1, 1]} : vector<4x256xf32> to vector<1x256xf32>
    %40 = vector.broadcast %38 : vector<8x1xf32> to vector<8x256xf32>
    %41 = vector.broadcast %39 : vector<1x256xf32> to vector<8x256xf32>
    %42 = arith.mulf %40, %41 : vector<8x256xf32>
    %43 = arith.addf %37, %42 : vector<8x256xf32>
    %44 = vector.extract_strided_slice %36 {offsets = [0, 1], sizes = [8, 1], strides = [1, 1]} : vector<8x4xf32> to vector<8x1xf32>
    %45 = vector.extract_strided_slice %4 {offsets = [1, 0], sizes = [1, 256], strides = [1, 1]} : vector<4x256xf32> to vector<1x256xf32>
    %46 = vector.broadcast %44 : vector<8x1xf32> to vector<8x256xf32>
    %47 = vector.broadcast %45 : vector<1x256xf32> to vector<8x256xf32>
    %48 = arith.mulf %46, %47 : vector<8x256xf32>
    %49 = arith.addf %43, %48 : vector<8x256xf32>
    %50 = vector.extract_strided_slice %36 {offsets = [0, 2], sizes = [8, 1], strides = [1, 1]} : vector<8x4xf32> to vector<8x1xf32>
    %51 = vector.extract_strided_slice %4 {offsets = [2, 0], sizes = [1, 256], strides = [1, 1]} : vector<4x256xf32> to vector<1x256xf32>
    %52 = vector.broadcast %50 : vector<8x1xf32> to vector<8x256xf32>
    %53 = vector.broadcast %51 : vector<1x256xf32> to vector<8x256xf32>
    %54 = arith.mulf %52, %53 : vector<8x256xf32>
    %55 = arith.addf %49, %54 : vector<8x256xf32>
    %56 = vector.extract_strided_slice %36 {offsets = [0, 3], sizes = [8, 1], strides = [1, 1]} : vector<8x4xf32> to vector<8x1xf32>
    %57 = vector.extract_strided_slice %4 {offsets = [3, 0], sizes = [1, 256], strides = [1, 1]} : vector<4x256xf32> to vector<1x256xf32>
    %58 = vector.broadcast %56 : vector<8x1xf32> to vector<8x256xf32>
    %59 = vector.broadcast %57 : vector<1x256xf32> to vector<8x256xf32>
    %60 = arith.mulf %58, %59 : vector<8x256xf32>
    %61 = arith.addf %55, %60 : vector<8x256xf32>
    %c0_13 = arith.constant 0 : index
    %c0_14 = arith.constant 0 : index
    %c0_15 = arith.constant 0 : index
    %62 = vector.load %arg5[%c0_13, %c0_14, %c0_15] : memref<1x8x256xf32, #tpu.memory_space<vmem>>, vector<1x8x256xf32>
    %63 = vector.shape_cast %62 : vector<1x8x256xf32> to vector<8x256xf32>
    %64 = vector.shape_cast %61 : vector<8x256xf32> to vector<1x8x256xf32>
    tpu.vector_store %arg5[%c0_13, %c0_14, %c0_15], %64 {strides = array<i32>} : memref<1x8x256xf32, #tpu.memory_space<vmem>>, vector<1x8x256xf32>,
    return
  }
  func.func @transform_0(%arg0: i32) -> (i32, i32, i32) {
    %c0_i32 = arith.constant 0 : i32
    %c0_i32_0 = arith.constant 0 : i32
    %c0_i32_1 = arith.constant 0 : i32
    return %arg0, %c0_i32, %c0_i32_0 : i32, i32, i32
  }
  func.func @transform_1(%arg0: i32) -> (i32, i32) {
    %c0_i32 = arith.constant 0 : i32
    %c0_i32_0 = arith.constant 0 : i32
    %c0_i32_1 = arith.constant 0 : i32
    return %c0_i32, %c0_i32_0 : i32, i32
  }
  func.func @transform_2(%arg0: i32) -> (i32, i32) {
    %c0_i32 = arith.constant 0 : i32
    %c0_i32_0 = arith.constant 0 : i32
    %c0_i32_1 = arith.constant 0 : i32
    return %c0_i32, %c0_i32_0 : i32, i32
  }
  func.func @transform_3(%arg0: i32) -> (i32, i32) {
    %c0_i32 = arith.constant 0 : i32
    %c0_i32_0 = arith.constant 0 : i32
    %c0_i32_1 = arith.constant 0 : i32
    return %c0_i32, %c0_i32_0 : i32, i32
  }
  func.func @transform_4(%arg0: i32) -> (i32, i32, i32) {
    %c0_i32 = arith.constant 0 : i32
    %c0_i32_0 = arith.constant 0 : i32
    %c0_i32_1 = arith.constant 0 : i32
    return %arg0, %c0_i32, %c0_i32_0 : i32, i32, i32
  }
}

</mosaic_0001>

<bundles_post_ra>
// kernel: tpu_custom_call.1
= control target key start
LH: loop header
LB: loop body
LE: loop exit
PB: predicated region body
PF: predicated region fallthrough
CT: control target
= control target key end

     0   :  { %9 = vsyncpa [#allocation3], 0  ;;  %s723_s0 = inlined_call_operand.vmem [shape: f32[2,4,256], index: 0, kind: input, shape index: {}]   ;;  %s724_s1 = inlined_call_operand.vmem [shape: f32[4,4], index: 1, kind: input, shape index: {}]   ;;  %s725_s2 = inlined_call_operand.vmem [shape: f32[4,1], index: 2, kind: input, shape index: {}]   ;;  %s726_s3 = inlined_call_operand.vmem [shape: f32[32,4], index: 3, kind: input, shape index: {}]   ;;  %s727_s4 = inlined_call_operand.hbm [shape: f32[2,8,256], index: 4, kind: output, shape index: {}]  }
   0x1   :  { %11 = vsyncpa [#allocation3 + $0x1], 0  ;;  %s602_s15 = smov 0   ;;  %s604_s16 = smov 0  }
   0x2   :  { %s606_s17 = smov 0   ;;  %s608_s18 = smov 0  }
   0x3 LB: > { %s623_s19 = sadd.s32 4294967295, %s570_s18   ;;  %s428_s20 = sadd.s32 4294967294, %s570_s18   ;;  %s570_s18 = sphi %s608_s18, %s733_s18   ;;  %s566_s17 = sphi %s606_s17, %s732_s17   ;;  %s562_s16 = sphi %s604_s16, %s731_s16   ;;  %s558_s15 = sphi %s602_s15, %s730_s15  }
   0x4   : > { %s627_s21 = sadd.s32 1, %s570_s18   ;;  %s113_s22 = sadd.s32 1, %s566_s17 }
   0x5   : > { %s110_s23 = ssub.s32 %s570_s18, %s627_s21  ;;  %p123_p0 = scmp.ne.s32.totalorder %s566_s17, %s562_s16 }
   0x6   : > { %p111_p1 = scmp.eq.s32.totalorder %s110_s23, 0  ;;  %p124_p2 = scmp.eq.s32.totalorder %s623_s19, 1 }
   0x7   : > { %p129_p3 = scmp.ne.s32.totalorder %s562_s16, %s558_s15  ;;  %p130_p4 = scmp.eq.s32.totalorder %s428_s20, 1 }
   0x8   : > { %s638_s24 = scalar_select %p111_p1, %s566_s17, %s113_s22  }
   0x9   : > { %p640_p5 = por %p124_p2, %p123_p0  ;;  %p644_p6 = por %p130_p4, %p129_p3 }
   0xa   : > { %p431_p7 = scmp.ge.s32.totalorder %s570_s18, 1  ;;  %p165_p8 = scmp.lt.s32.totalorder %s570_s18, 3 }
   0xc   : > { %p166_p9 = pnand %p431_p7, %p165_p8 }
   0xd   : > { %p191_p10 = scmp.lt.s32.totalorder (!%p166_p9), %s623_s19, 1  ;;  %s444_s7 = sshll.u32 (!%p166_p9), %s623_s19, 4 }
   0xe   : > { %169 = sbr.rel (%p166_p9) target bundleno = 505 (0x1f9), region = 36 }
  0x13   : > { %s192_s27 = scalar_select %p191_p10, %s623_s19, 1  ;;  %vm209_vm0 = vcmask 1043456   ;;  %v572_v6 = vmov 256.0   ;;  %v196_v15 = vld [vmem:[%s724_s1] sm:$0xf]  ;;  %vm223_vm2 = vcmask 31744  }
  0x14   : > { %502 = vrcp.f32 %v572_v6  ;;  %v197_v16 = vld [vmem:[%s725_s2] sm:$0xf]  ;;  %v573_v35 = vmov 3   ;;  %v574_v36 = vmov 1   ;;  %v575_v37 = vmov 0   ;;  %v199_v40 = vld [vmem:[%s726_s3 + $0x8] sm:$0xff] }
  0x15   : > { %s443_s28 = sshll.u32 %s192_s27, 3  ;;  %500 = vset.pattern.permute.xlu2 %v573_v35  ;;  %498 = vset.pattern.permute.xlu1 %v574_v36  ;;  %v198_v38 = vld [vmem:[%s726_s3] sm:$0xff]  ;;  %v200_v42 = vld [vmem:[%s726_s3 + $0x10] sm:$0xff]  ;;  %v201_v46 = vld [vmem:[%s726_s3 + $0x18] sm:$0xff]  ;;  %v576_v53 = vmov 2  }
  0x16   : > { %s195_s5 = scalar_lea.vmem %s723_s0, %s443_s28  ;;  %497 = vset.pattern.permute.xlu0 %v575_v37 }
  0x17   : > { %v655_v0 = vld [vmem:[%s195_s5] sm:$0xff]  ;;  %s188_s5 = sand.u32 1, %s562_s16  }
  0x18   : > { %204 = vst [vmem:[#allocation1] ss:$2 sm:$0xff] %v655_v0  ;;  %v312_v54 = vperm.slane %v655_v0, 1  ;;  %v313_v55 = vperm.slane %v655_v0, 5  ;;  %v298_v56 = vperm.slane %v655_v0, 0  ;;  %v299_v57 = vperm.slane %v655_v0, 4 }
  0x19   : > { %v326_v59 = vperm.slane %v655_v0, 2  ;;  %v327_v60 = vperm.slane %v655_v0, 6  ;;  %s432_s6 = sshll.u32 %s188_s5, 4  ;;  %s353_s13 = scalar_lea.sflag [#allocation3], %s188_s5 }
  0x1a   : > { %v503_v7 = vpop.eup %502  ;;  %v316_v61 = vperm.slane %v312_v54, 1  ;;  %v317_v62 = vperm.slane %v313_v55, 1  ;;  %v302_v63 = vperm.slane %v298_v56, 0  ;;  %s190_s11 = scalar_lea.vmem [#allocation2], %s432_s6 }
  0x1b   : > { %v216_v8 = vmul.f32 256.0, %v503_v7  ;;  %vm220_vm1 = vweird.f32 %v503_v7  ;;  %v331_v6 = vperm.slane %v327_v60, 2  ;;  %s366_s19 = sshll.u32 %s190_s11, 4  ;;  %s367_s19 = int_to_ptr.vmem [resolvable:$true] %s366_s19 }
  0x1d   : > { %v217_v9 = vsub.f32 1.0, %v216_v8 }
  0x1f   : > { %v205_v1 = vld.sshfl [vmem:[#allocation1] sm:$0xff pattern:$0x75316420]  ;;  %v206_v2 = vld.sshfl [vmem:[#allocation1 + $0x8] sm:$0xff pattern:$0x75316420]  ;;  %v218_v10 = vmul.f32 %v503_v7, %v217_v9 }
  0x20   : > { %v210_v3 = vsel %vm209_vm0, %v205_v1, 0.0  ;;  %v211_v4 = vsel %vm209_vm0, %v206_v2, 0.0  ;;  %v303_v1 = vperm.slane %v299_v57, 0 }
  0x21   : > { %v212_v5 = vadd.f32 %v211_v4, %v210_v3  ;;  %v219_v11 = vadd.f32 %v503_v7, %v218_v10  ;;  %v340_v3 = vperm.slane %v655_v0, 3  ;;  %v341_v4 = vperm.slane %v655_v0, 7 }
  0x23   : > { %213 = vadd.xlane.f32.xlu0 %v212_v5  ;;  %v221_v12 = vsel %vm220_vm1, %v503_v7, %v219_v11  ;;  %v330_v5 = vperm.slane %v326_v59, 2  ;;  %v344_v11 = vperm.slane %v340_v3, 3 }
  0x96   : > { %v214_v13 = vpop.xlane.xlu0 %213 }
  0x97   : > { %v222_v14 = vmul.f32 %v221_v12, %v214_v13  ;;  %v345_v12 = vperm.slane %v341_v4, 3 }
  0x99   : > { %435 = vmatpush.msk.msra.mxu0 %vm209_vm0, %v222_v14 }
  0x9a   : > { %436 = vmatmul.msk.f32.vlgmr.msra.gmra.mxu0 %vm223_vm2, %v196_v15 }
 0x117   : > { %v247_v17 = vpop.f32.mrf.mxu0 }
 0x118   : > { %v248_v18 = vadd.f32 %v247_v17, %v197_v16 }
 0x11a   : > { %v437_v19 = vmul.f32 -1.442695, %v248_v18 }
 0x11c   : > { %504 = vpow2.f32 %v437_v19 }
 0x122   : > { %v505_v20 = vpop.eup %504 }
 0x123   : > { %v253_v21 = vadd.f32 1.0, %v505_v20 }
 0x125   : > { %506 = vrcp.f32 %v253_v21  ;;  %v265_v25 = vand.u32 2147483648, %v253_v21  ;;  %v263_v27 = vand.u32 2147483647, %v253_v21  ;;  %vm259_vm4 = vweird.f32 %v253_v21 }
 0x127   : > { %v266_v29 = vor.u32 1.1754944e-38, %v265_v25  ;;  %vm264_vm6 = vcmp.eq.f32.partialorder %v263_v27, 8.507059e+37 }
 0x12b   : > { %v507_v22 = vpop.eup %506 }
 0x12c   : > { %v255_v23 = vmul.f32 %v507_v22, %v253_v21  ;;  %vm260_vm3 = vweird.f32 %v507_v22 }
 0x12d   : > { %vm261_vm5 = vmor %vm259_vm4, %vm260_vm3 }
 0x12e   : > { %v256_v24 = vsub.f32 1.0, %v255_v23 }
 0x130   : > { %v257_v26 = vmul.f32 %v507_v22, %v256_v24 }
 0x132   : > { %v258_v28 = vadd.f32 %v507_v22, %v257_v26 }
 0x134   : > { %v262_v30 = vsel %vm261_vm5, %v507_v22, %v258_v28 }
 0x135   : > { %v267_v31 = vsel %vm264_vm6, %v266_v29, %v262_v30 }
 0x136   : > { %445 = vpush %v267_v31  ;;  %v275_v32 = vrot.slane %v267_v31, 1  ;;  %v281_v33 = vrot.slane %v267_v31, 2  ;;  %v287_v34 = vrot.slane %v267_v31, 3 }
 0x138   : > { %447 = vpush %v275_v32 }
 0x139   : > { %449 = vpush %v281_v33 }
 0x13a   : > { %451 = vpush %v287_v34 }
 0x167   : > { %s446_s10 = spop %445 }
 0x168   : > { %v271_v39 = vstv %s446_s10  ;;  %s364_s10 = scalar_lea.hbm %s727_s4, %s444_s7 }
 0x169   : > { %s448_s20 = spop %447  ;;  %v273_v43 = vmul.f32 %v271_v39, %v198_v38  ;;  %s368_s12 = sshll.u32 %s364_s10, 4  ;;  %s369_s12 = int_to_ptr.hbm [resolvable:$true] %s368_s12 }
 0x16a   : > { %v277_v41 = vstv %s448_s20  ;;  %s450_s27 = spop %449  ;;  %s522_s14 = sshra.s32 %s369_s12, 4  ;;  %s523_s14 = int_to_ptr.hbm [resolvable:$true] %s522_s14 }
 0x16b   : > { %v279_v44 = vmul.f32 %v277_v41, %v199_v40  ;;  %v283_v45 = vstv %s450_s27  ;;  %s452_s28 = spop %451  ;;  %s524_s20 = scalar_lea.hbm %s523_s14, 16 }
 0x16c   : > { %v289_v47 = vstv %s452_s28  ;;  %v285_v49 = vmul.f32 %v283_v45, %v200_v42  ;;  %p525_p11 = scmp.ne.s32.totalorder %s523_s14, %s524_s20  ;;  %s528_s27 = scalar_lea.hbm %s727_s4, 32 }
 0x16d   : > { %v280_v48 = vadd.f32 %v279_v44, %v273_v43  ;;  %v291_v51 = vmul.f32 %v289_v47, %v201_v46  ;;  %p529_p0 = scmp.lt.s32.totalorder %s523_s14, %s727_s4  ;;  %p530_p1 = scmp.lt.s32.totalorder %s528_s27, %s524_s20 }
 0x16e   : > { %p526_p12 = pnand %p525_p11, %p640_p5 }
 0x16f   : > { %v286_v50 = vadd.f32 %v285_v49, %v280_v48  ;;  %p531_p2 = por %p530_p1, %p529_p0 }
 0x170   : > { %p527_p13 = pneg %p526_p12 }
 0x171   : > { %v292_v52 = vadd.f32 %v291_v51, %v286_v50 }
 0x172   : > { %p532_p3 = pnand %p531_p2, %p527_p13 }
 0x173   : > { %337 = vperm.xlu2 %500, %v292_v52   ;;  %309 = vperm.xlu1 %498, %v292_v52  }
 0x174   : > { %295 = vperm.xlu0 %497, %v292_v52  }
 0x17b   : > { %499 = vset.pattern.permute.xlu1 %v576_v53 }
 0x17c   : > { %323 = vperm.xlu1 %499, %v292_v52   ;;  %501 = vset.pattern.permute.xlu0 %v573_v35 }
 0x1cd   : > { %v338_v13 = vpop.permute.xlu2 %337 }
 0x1ce   : > { %v346_v18 = vmul.f32 %v344_v11, %v338_v13  ;;  %v347_v19 = vmul.f32 %v345_v12, %v338_v13 }
 0x1e5   : > { %v310_v58 = vpop.permute.xlu1 %309 }
 0x1e6   : > { %v296_v2 = vpop.permute.xlu0 %295  ;;  %v318_v7 = vmul.f32 %v316_v61, %v310_v58  ;;  %v319_v8 = vmul.f32 %v317_v62, %v310_v58 }
 0x1e7   : > { %v304_v9 = vmul.f32 %v302_v63, %v296_v2  ;;  %v305_v10 = vmul.f32 %v303_v1, %v296_v2 }
 0x1e9   : > { %v320_v15 = vadd.f32 %v318_v7, %v304_v9  ;;  %v321_v16 = vadd.f32 %v319_v8, %v305_v10 }
 0x1ee   : > { %v324_v14 = vpop.permute.xlu1 %323 }
 0x1ef   : > { %v332_v0 = vmul.f32 %v330_v5, %v324_v14  ;;  %v333_v17 = vmul.f32 %v331_v6, %v324_v14 }
 0x1f1   : > { %v334_v20 = vadd.f32 %v332_v0, %v320_v15  ;;  %v335_v21 = vadd.f32 %v333_v17, %v321_v16 }
 0x1f3   : > { %v348_v22 = vadd.f32 %v346_v18, %v334_v20  ;;  %v349_v23 = vadd.f32 %v347_v19, %v335_v21 }
 0x1f5   : > { %350 = vst [vmem:[%s190_s11] sm:$0xff] %v348_v22 }
 0x1f6   : > { %351 = vst [vmem:[%s190_s11 + $0x8] sm:$0xff] %v349_v23 }
 0x1f7   : > { %535 = shalt.err (!%p532_p3)
}
 0x1f8   : > { %453 = dma.vmem_to_hbm [thread:$0]  (%p640_p5), %s367_s19, 256, %s369_s12, %s353_s13  }
 0x1f9 PF: > { %p459_p4 = scmp.ge.s32.totalorder %s570_s18, 2  ;;  %s380_s30 = sand.u32 1, %s558_s15  }
 0x1fa   : > { %s381_s5 = scalar_lea.sflag [#allocation3], %s380_s30 }
 0x1fb   : > { %p456_p7 = pnand %p459_p4, %p644_p6 }
 0x1fd   : > { %p457_p8 = pneg %p456_p7 }
 0x1ff   : > { %553 = dma.done.wait (%p457_p8), %s381_s5, 256  }
 0x200   : > { %555 = vsyncadd (%p457_p8), %s381_s5, 4294967040  ;;  %p14_p9 = scmp.ge.s32.totalorder %s627_s21, 4   ;;  %s730_s15 = smov %s562_s16 }
 0x201   : > { %s731_s16 = smov %s566_s17  ;;  %s732_s17 = smov %s638_s24 }
 0x202   : > { %s733_s18 = smov %s627_s21  ;;  %16 = sbr.rel (!%p14_p9) target bundleno = 3 (0x3), region = 71 }
 0x207   :  { %387 = vsyncpa [#allocation3], 1 }
 0x208   :  { %389 = vsyncpa [#allocation3 + $0x1], 1 }

</bundles_post_ra>
